<compile_context>
chip_gen: v7x
topology: tpu7x:2x2x1
jax: 0.10.0
libtpu: 0.0.40
codegen_flags: <defaults>
</compile_context>

<pallas_src>
import functools

import jax
import jax.numpy as jnp
from jax.experimental import pallas as pl
from jax.experimental.pallas import tpu as pltpu


_VMEM_LIMIT_BYTES = 32 * 1024 * 1024  # explicit scoped-VMEM budget (fits v7x's 64 MiB)


def _attention_kernel(feat_ref, mask_ref, w1_ref, b1_ref, w2_ref, out_ref, *,
                      approx_recip):
    # feat_ref : (BT, S, F)
    # mask_ref : (BT, S)  int32 (1 = keep, 0 = masked)
    # w1_ref   : (F, A)   affine1.weight^T
    # b1_ref   : (1, A)   affine1.bias
    # w2_ref   : (1, A)   affine2.weight
    # out_ref  : (BT, F)
    bt, s, f = feat_ref.shape
    a = w1_ref.shape[1]

    feat = feat_ref[...]                                        # (BT, S, F)

    # --- affine1 + tanh: single big MXU matmul over the whole batch tile ---
    feat2d = feat.reshape(bt * s, f)                            # merge leading dims
    h = jnp.tanh(
        jnp.dot(feat2d, w1_ref[...], preferred_element_type=jnp.float32)
        + b1_ref[...]
    )                                                           # (BT*S, A) f32

    # --- affine2 (no bias): scores in (BT, S) row layout, S on the lane axis ---
    h3 = h.reshape(bt, s, a)                                    # (BT, S, A)
    scores = jnp.sum(h3 * w2_ref[...], axis=-1)                 # (BT, S)

    # --- mask + softmax over the sequence (lane reductions) ---
    scores = jnp.where(mask_ref[...] == 0, jnp.float32(-1e9), scores)
    m = jnp.max(scores, axis=-1, keepdims=True)                 # (BT, 1)
    e = jnp.exp(scores - m)                                     # (BT, S)
    denom = jnp.sum(e, axis=-1, keepdims=True)                  # (BT, 1)
    alpha = e * pl.reciprocal(denom, approx=approx_recip)       # (BT, S)

    # --- weighted pooling on the MXU: (BT,1,S) @ (BT,S,F) -> (BT,1,F) ---
    pooled = jax.lax.dot_general(
        alpha.astype(feat.dtype)[:, None, :], feat,
        dimension_numbers=(((2,), (1,)), ((0,), (0,))),
        preferred_element_type=jnp.float32,
    )                                                           # (BT, 1, F)
    out_ref[...] = pooled[:, 0, :].astype(out_ref.dtype)


def _choose_batch_tile(B, S, F, itemsize):
    # Fill the MXU M dimension: aim for ~256 rows per tile (>=128 already keeps
    # v5e's 128-wide MXU busy).
    target_rows = 256
    bt = max(1, target_rows // max(S, 1))
    # Keep the double-buffered feature tile well inside the scoped VMEM budget
    # (sized conservatively so the same tiling is safe on v7x's 64 MiB VMEM).
    per_batch_bytes = max(1, S * F * itemsize)
    max_bt = max(1, (_VMEM_LIMIT_BYTES // 4) // (2 * per_batch_bytes))
    bt = min(bt, max_bt, B)
    if bt < B:
        bt = ((bt + 7) // 8) * 8  # sublane-align partial batch tiles
    return bt


def attention_forward(feature, w1, b1, w2, mask=None, *, batch_tile=None,
                      matmul_dtype=None, approx_softmax=True):
    """feature: (B, S, F); w1: (F, A); b1: (A,); w2: (A,); mask: (B, S) or None.

    Returns (B, F), matching the PyTorch module's output.
    matmul_dtype=jnp.bfloat16 streams feature/W1 in bf16 (f32 accumulation).
    """
    B, S, F = feature.shape
    A = w1.shape[1]
    out_dtype = feature.dtype

    if mask is None:
        mask_i = jnp.ones((B, S), dtype=jnp.int32)
    else:
        # Integer mask: exactly reproduces torch's `mask == 0` test while
        # avoiding float-equality pitfalls inside the kernel.
        mask_i = (mask.reshape(B, S) != 0).astype(jnp.int32)

    if batch_tile is None:
        bt = _choose_batch_tile(B, S, F, jnp.dtype(feature.dtype).itemsize)
    else:
        bt = batch_tile

    Bp = pl.cdiv(B, bt) * bt
    if Bp != B:
        pad = Bp - B
        feature = jnp.pad(feature, ((0, pad), (0, 0), (0, 0)))
        mask_i = jnp.pad(mask_i, ((0, pad), (0, 0)), constant_values=1)

    if matmul_dtype is not None:
        feat_in = feature.astype(matmul_dtype)
        w1_in = w1.astype(matmul_dtype)
    else:
        feat_in = feature
        w1_in = w1

    b1_2d = b1.reshape(1, A)
    w2_2d = w2.reshape(1, A)

    kernel = functools.partial(_attention_kernel, approx_recip=approx_softmax)

    out = pl.pallas_call(
        kernel,
        out_shape=jax.ShapeDtypeStruct((Bp, F), out_dtype),
        grid_spec=pltpu.PrefetchScalarGridSpec(
            num_scalar_prefetch=0,
            grid=(Bp // bt,),
            in_specs=[
                pl.BlockSpec((bt, S, F), lambda i: (i, 0, 0)),   # feature tile
                pl.BlockSpec((bt, S), lambda i: (i, 0)),         # mask tile
                pl.BlockSpec((F, A), lambda i: (0, 0)),          # W1 (shared)
                pl.BlockSpec((1, A), lambda i: (0, 0)),          # b1 (shared)
                pl.BlockSpec((1, A), lambda i: (0, 0)),          # W2 (shared)
            ],
            out_specs=pl.BlockSpec((bt, F), lambda i: (i, 0)),   # lane-dense output
        ),
        compiler_params=pltpu.CompilerParams(
            dimension_semantics=("parallel",),       # megacore / v7x 2-TC sharding
            vmem_limit_bytes=_VMEM_LIMIT_BYTES,
        ),
    )(feat_in, mask_i, w1_in, b1_2d, w2_2d)

    if Bp != B:
        out = out[:B]
    return out


def _reference(feature, w1, b1, w2, mask=None):
    h = jnp.tanh(feature @ w1 + b1)                       # (B, S, A)
    a = jnp.einsum("bsa,a->bs", h, w2)                    # (B, S)
    if mask is not None:
        a = jnp.where(mask == 0, -1e9, a)
    alpha = jax.nn.softmax(a, axis=1)                     # (B, S)
    return jnp.einsum("bs,bsf->bf", alpha, feature)       # (B, F)


if __name__ == "__main__":
    B, S, FEAT, ATT = 2, 8, 32, 16

    key = jax.random.PRNGKey(0)
    k_feat, k_w1, k_w2, k_mask = jax.random.split(key, 4)

    feature = jax.random.normal(k_feat, (B, S, FEAT), dtype=jnp.float32)

    # Deterministic parameter init (xavier_uniform shapes, matching initialize()).
    gain_tanh = 5.0 / 3.0
    lim1 = gain_tanh * (6.0 / (FEAT + ATT)) ** 0.5
    w1 = jax.random.uniform(k_w1, (FEAT, ATT), jnp.float32, -lim1, lim1)  # affine1.weight^T
    b1 = jnp.zeros((ATT,), dtype=jnp.float32)                             # affine1.bias
    lim2 = (6.0 / (ATT + 1)) ** 0.5
    w2 = jax.random.uniform(k_w2, (ATT,), jnp.float32, -lim2, lim2)       # affine2.weight

    # Optional mask (B, S): 1 = keep, 0 = masked; at least one valid position/row.
    mask = (jax.random.uniform(k_mask, (B, S)) > 0.2).astype(jnp.int32)
    mask = mask.at[:, 0].set(1)

    # Exact-reciprocal path: tight check against the pure-JAX reference.
    out_nomask = jax.block_until_ready(
        attention_forward(feature, w1, b1, w2, mask=None, approx_softmax=False))
    ref_nomask = _reference(feature, w1, b1, w2, mask=None)
    assert jnp.allclose(out_nomask, ref_nomask, atol=1e-4, rtol=1e-4)

    out_mask = jax.block_until_ready(
        attention_forward(feature, w1, b1, w2, mask=mask, approx_softmax=False))
    ref_mask = _reference(feature, w1, b1, w2, mask=mask)
    assert jnp.allclose(out_mask, ref_mask, atol=1e-4, rtol=1e-4)

    # Default fast path (EUP approximate reciprocal): looser tolerance.
    out_fast = jax.block_until_ready(attention_forward(feature, w1, b1, w2, mask=mask))
    assert jnp.allclose(out_fast, ref_mask, atol=1e-2, rtol=1e-2)

    print("KERNEL_OK")
</pallas_src>

<mosaic_0001>
module attributes {stable_mosaic.version = 11 : i64} {
  func.func @_attention_kernel(%arg0: i32, %arg1: memref<2x8x32xf32, #tpu.memory_space<vmem>>, %arg2: memref<2x8xi32, #tpu.memory_space<vmem>>, %arg3: memref<32x16xf32, #tpu.memory_space<vmem>>, %arg4: memref<1x16xf32, #tpu.memory_space<vmem>>, %arg5: memref<1x16xf32, #tpu.memory_space<vmem>>, %arg6: memref<2x32xf32, #tpu.memory_space<vmem>>) attributes {dimension_semantics = [#tpu.dimension_semantics<parallel>], iteration_bounds = array<i64: 1>, scalar_prefetch = 0 : i64, scratch_operands = 0 : i64, tpu.core_type = #tpu.core_type<tc>, window_params = [{transform_indices = @transform_0, window_bounds = array<i64: 2, 8, 32>}, {transform_indices = @transform_1, window_bounds = array<i64: 2, 8>}, {pipeline_mode = #tpu.pipeline_mode<synchronous>, transform_indices = @transform_2, window_bounds = array<i64: 32, 16>}, {pipeline_mode = #tpu.pipeline_mode<synchronous>, transform_indices = @transform_3, window_bounds = array<i64: 1, 16>}, {pipeline_mode = #tpu.pipeline_mode<synchronous>, transform_indices = @transform_4, window_bounds = array<i64: 1, 16>}, {transform_indices = @transform_5, window_bounds = array<i64: 2, 32>}]} {
    %c0 = arith.constant 0 : index
    %c0_0 = arith.constant 0 : index
    %c0_1 = arith.constant 0 : index
    %0 = vector.load %arg1[%c0, %c0_0, %c0_1] : memref<2x8x32xf32, #tpu.memory_space<vmem>>, vector<2x8x32xf32>
    %1 = vector.shape_cast %0 : vector<2x8x32xf32> to vector<16x32xf32>
    %c0_2 = arith.constant 0 : index
    %c0_3 = arith.constant 0 : index
    %2 = vector.load %arg3[%c0_2, %c0_3] : memref<32x16xf32, #tpu.memory_space<vmem>>, vector<32x16xf32>
    %cst = arith.constant dense<0.000000e+00> : vector<16x16xf32>
    %3 = tpu.matmul %1, %2, %cst {dimension_numbers = #tpu.dot_dimension_numbers<[1], [0], [0], [1], [0, 0, 1, 1], [], []>} : vector<16x32xf32>, vector<32x16xf32>, vector<16x16xf32> -> vector<16x16xf32>
    %c0_4 = arith.constant 0 : index
    %c0_5 = arith.constant 0 : index
    %4 = vector.load %arg4[%c0_4, %c0_5] : memref<1x16xf32, #tpu.memory_space<vmem>>, vector<1x16xf32>
    %5 = vector.broadcast %4 : vector<1x16xf32> to vector<16x16xf32>
    %6 = arith.addf %3, %5 : vector<16x16xf32>
    %7 = math.tanh %6 : vector<16x16xf32>
    %8 = vector.shape_cast %7 : vector<16x16xf32> to vector<2x8x16xf32>
    %c0_6 = arith.constant 0 : index
    %c0_7 = arith.constant 0 : index
    %9 = vector.load %arg5[%c0_6, %c0_7] : memref<1x16xf32, #tpu.memory_space<vmem>>, vector<1x16xf32>
    %10 = vector.shape_cast %9 : vector<1x16xf32> to vector<1x1x16xf32>
    %11 = vector.broadcast %10 : vector<1x1x16xf32> to vector<2x8x16xf32>
    %12 = arith.mulf %8, %11 : vector<2x8x16xf32>
    %cst_8 = arith.constant dense<0.000000e+00> : vector<2x8xf32>
    %13 = vector.multi_reduction <add>, %12, %cst_8 [2] : vector<2x8x16xf32> to vector<2x8xf32>
    %c0_9 = arith.constant 0 : index
    %c0_10 = arith.constant 0 : index
    %14 = vector.load %arg2[%c0_9, %c0_10] : memref<2x8xi32, #tpu.memory_space<vmem>>, vector<2x8xi32>
    %c0_i32 = arith.constant 0 : i32
    %15 = vector.broadcast %c0_i32 : i32 to vector<2x8xi32>
    %16 = arith.cmpi eq, %14, %15 : vector<2x8xi32>
    %cst_11 = arith.constant -1.000000e+09 : f32
    %17 = vector.broadcast %cst_11 : f32 to vector<2x8xf32>
    %18 = arith.select %16, %17, %13 : vector<2x8xi1>, vector<2x8xf32>
    %cst_12 = arith.constant dense<0xFF800000> : vector<2xf32>
    %19 = vector.multi_reduction <maximumf>, %18, %cst_12 [1] : vector<2x8xf32> to vector<2xf32>
    %20 = vector.shape_cast %19 : vector<2xf32> to vector<2x1xf32>
    %21 = vector.broadcast %20 : vector<2x1xf32> to vector<2x8xf32>
    %22 = arith.subf %18, %21 : vector<2x8xf32>
    %23 = math.exp %22 : vector<2x8xf32>
    %cst_13 = arith.constant dense<0.000000e+00> : vector<2xf32>
    %24 = vector.multi_reduction <add>, %23, %cst_13 [1] : vector<2x8xf32> to vector<2xf32>
    %25 = vector.shape_cast %24 : vector<2xf32> to vector<2x1xf32>
    %26 = tpu.reciprocal %25 : vector<2x1xf32> -> vector<2x1xf32>
    %27 = vector.broadcast %26 : vector<2x1xf32> to vector<2x8xf32>
    %28 = arith.mulf %23, %27 : vector<2x8xf32>
    %29 = vector.shape_cast %28 : vector<2x8xf32> to vector<2x1x8xf32>
    %cst_14 = arith.constant dense<0.000000e+00> : vector<2x1x32xf32>
    %30 = tpu.matmul %29, %0, %cst_14 {dimension_numbers = #tpu.dot_dimension_numbers<[2], [1], [1], [2], [0, 0, 0, 1, 1, 2], [0], [0]>} : vector<2x1x8xf32>, vector<2x8x32xf32>, vector<2x1x32xf32> -> vector<2x1x32xf32>
    %31 = vector.shape_cast %30 : vector<2x1x32xf32> to vector<2x32xf32>
    %c0_15 = arith.constant 0 : index
    %c0_16 = arith.constant 0 : index
    %32 = vector.load %arg6[%c0_15, %c0_16] : memref<2x32xf32, #tpu.memory_space<vmem>>, vector<2x32xf32>
    tpu.vector_store %arg6[%c0_15, %c0_16], %31 {strides = array<i32>} : memref<2x32xf32, #tpu.memory_space<vmem>>, vector<2x32xf32>,
    return
  }
  func.func @transform_0(%arg0: i32) -> (i32, i32, i32) {
    %c0_i32 = arith.constant 0 : i32
    %c0_i32_0 = arith.constant 0 : i32
    %c0_i32_1 = arith.constant 0 : i32
    return %arg0, %c0_i32, %c0_i32_0 : i32, i32, i32
  }
  func.func @transform_1(%arg0: i32) -> (i32, i32) {
    %c0_i32 = arith.constant 0 : i32
    %c0_i32_0 = arith.constant 0 : i32
    return %arg0, %c0_i32 : i32, i32
  }
  func.func @transform_2(%arg0: i32) -> (i32, i32) {
    %c0_i32 = arith.constant 0 : i32
    %c0_i32_0 = arith.constant 0 : i32
    %c0_i32_1 = arith.constant 0 : i32
    return %c0_i32, %c0_i32_0 : i32, i32
  }
  func.func @transform_3(%arg0: i32) -> (i32, i32) {
    %c0_i32 = arith.constant 0 : i32
    %c0_i32_0 = arith.constant 0 : i32
    %c0_i32_1 = arith.constant 0 : i32
    return %c0_i32, %c0_i32_0 : i32, i32
  }
  func.func @transform_4(%arg0: i32) -> (i32, i32) {
    %c0_i32 = arith.constant 0 : i32
    %c0_i32_0 = arith.constant 0 : i32
    %c0_i32_1 = arith.constant 0 : i32
    return %c0_i32, %c0_i32_0 : i32, i32
  }
  func.func @transform_5(%arg0: i32) -> (i32, i32) {
    %c0_i32 = arith.constant 0 : i32
    %c0_i32_0 = arith.constant 0 : i32
    return %arg0, %c0_i32 : i32, i32
  }
}

</mosaic_0001>

<bundles_post_ra>
// kernel: tpu_custom_call.1
= control target key start
LH: loop header
LB: loop body
LE: loop exit
PB: predicated region body
PF: predicated region fallthrough
CT: control target
= control target key end

     0   :  { %vm34_vm0 = vcmask 261120   ;;  %s511_s0 = inlined_call_operand.vmem [shape: f32[2,8,32], index: 0, kind: input, shape index: {}]   ;;  %s512_s1 = inlined_call_operand.vmem [shape: s32[2,8], index: 1, kind: input, shape index: {}]   ;;  %s513_s2 = inlined_call_operand.vmem [shape: f32[32,16], index: 2, kind: input, shape index: {}]   ;;  %s514_s3 = inlined_call_operand.vmem [shape: f32[1,16], index: 3, kind: input, shape index: {}]   ;;  %s515_s4 = inlined_call_operand.vmem [shape: f32[1,16], index: 4, kind: input, shape index: {}]   ;;  %s516_s5 = inlined_call_operand.hbm [shape: f32[2,32], index: 5, kind: output, shape index: {}]  }
   0x1   :  { %v23_v0 = vld [vmem:[%s513_s2] sm:$0xff]  ;;  %v24_v1 = vld [vmem:[%s513_s2 + $0x8] sm:$0xff]  ;;  %v25_v2 = vld [vmem:[%s513_s2 + $0x10] sm:$0xff] }
   0x2   :  { %v390_v3 = vpack.c.bf16 %v24_v1, %v23_v0  ;;  %v26_v4 = vld [vmem:[%s513_s2 + $0x18] sm:$0xff]  ;;  %v21_v5 = vld [vmem:[%s511_s0] sm:$0xff] }
   0x3   :  { %v394_v6 = vpack.c.bf16 %v26_v4, %v25_v2  ;;  %377 = vmatprep.mubr.msk.f32.mxu0 %vm34_vm0, %v21_v5 }
   0x4   :  { %10 = vsyncpa [#allocation3], 0  ;;  %391 = vmatprep.subr.bf16.mxu0 %v390_v3  ;;  %v22_v7 = vld [vmem:[%s511_s0 + $0x8] sm:$0xff]  ;;  %v353_v8 = vld [vmem:[%s514_s3] ss:$0 sm:$0xff]  ;;  %vm127_vm1 = vcmask 130048   ;;  %v138_v20 = vlaneseq }
   0x5   :  { %393 = vmatpush3.bf16.msra.mxu0 %v390_v3  ;;  %v356_v13 = vld [vmem:[%s515_s4] ss:$0 sm:$0xff]  ;;  %vm148_vm2 = vcmask 1041409   ;;  %vm152_vm4 = vcmask 58368   ;;  %v434_v37 = vmov 0.0   ;;  %vm435_vm5 = vmmov 0  }
   0x6   :  { %395 = vmatprep.subr.bf16.mxu0 %v394_v6  ;;  %v139_v21 = vand.u32 127, %v138_v20  ;;  %v141_v22 = vshrl.u32 %v138_v20, 7  ;;  %v134_v25 = vld [vmem:[%s512_s1] sm:$0x3]  ;;  %380 = vmatprep.subr.mxu1 %v434_v37  ;;  %v436_v39 = vmov 1966171168  }
   0x7   :  { %vm135_vm3 = vcmp.eq.s32.totalorder %v134_v25, 0  ;;  %382 = vmatprep.mubr.msk.f32.mxu1 %vm435_vm5, %v434_v37  ;;  %381 = vmatpush3.msra.mxu1 %v21_v5  ;;  %v166_v40 = vunpack.c.l.s4 %v436_v39  ;;  %vm187_vm6 = vcmask 64512   ;;  %s437_s1 = smov [#allocation2]   ;;  %vm337_vm7 = vcmask 254976  }
   0x8   :  { %v142_v24 = vsub.s32 %v139_v21, %v141_v22  ;;  %385 = vmatprep.subr.mxu1 %v434_v37  ;;  %s345_s4 = sshll.u32 %s437_s1, 4  ;;  %s346_s4 = int_to_ptr.vmem [resolvable:$true] %s345_s4 }
   0x9   :  { %397 = vmatpush3.bf16.msra.mxu0 %v394_v6  ;;  %v167_v41 = vunpack.c.0.s8 %v166_v40  ;;  %s410_s8 = scalar_lea.vmem %s346_s4, 32  ;;  %p415_p1 = scmp.lt.s32.totalorder %s346_s4, %s346_s4 }
   0xa   :  { %p411_p0 = scmp.ne.s32.totalorder %s346_s4, %s410_s8  ;;  %p416_p2 = scmp.lt.s32.totalorder %s410_s8, %s410_s8 }
   0xb   :  { %v170_v42 = vsub.s32 %v167_v41, %v141_v22 }
   0xc   :  { %378 = vmatmul.mubr.msk.f32.vlgmr.msra.gmra.mrb[0].mxu0 %vm34_vm0, %v22_v7  ;;  %p417_p3 = por %p416_p2, %p415_p1 }
   0xe   :  { %p418_p4 = pnand %p417_p3, %p411_p0 }
  0xdf   :  { %v379_v9 = vpop.f32.mrb[0].mxu0 }
  0xe0   :  { %v113_v10 = vadd.f32 %v379_v9, %v353_v8  ;;  %v107_v11 = vpop.f32.mrb[1].mxu0 }
  0xe1   :  { %v108_v12 = vadd.f32 %v353_v8, %v107_v11 }
  0xe2   :  { %402 = vtanh.f32 %v113_v10 }
  0xe3   :  { %404 = vtanh.f32 %v108_v12 }
  0xec   :  { %v403_v14 = vpop.eup %402 }
  0xed   :  { %v405_v15 = vpop.eup %404  ;;  %v126_v18 = vmul.f32 %v403_v14, %v356_v13 }
  0xee   :  { %v125_v16 = vmul.f32 %v405_v15, %v356_v13 }
  0xef   :  { %v131_v19 = vsel %vm127_vm1, %v126_v18, 0.0 }
  0xf0   :  { %v128_v17 = vsel %vm127_vm1, %v125_v16, 0.0 }
  0xf1   :  { %129 = vadd.xlane.f32.xlu0 %v128_v17 }
  0xf5   :  { %132 = vadd.xlane.f32.xlu0 %v131_v19 }
 0x17e   :  { %v130_v23 = vpop.xlane.xlu0 %129 }
 0x17f   :  { %v143_v27 = vrot.slane %v130_v23, %v142_v24 }
 0x182   :  { %v133_v26 = vpop.xlane.xlu0 %132 }
 0x183   :  { %v147_v28 = vrot.slane %v133_v26, %v142_v24 }
 0x185   :  { %v149_v29 = vsel %vm148_vm2, %v147_v28, %v143_v27 }
 0x186   :  { %v151_v30 = vsel %vm135_vm3, -1e+09, %v149_v29 }
 0x187   :  { %v153_v31 = vsel %vm152_vm4, %v151_v30, -inf }
 0x188   :  { %154 = vmax.xlane.f32.xlu1 %v153_v31 }
 0x215   :  { %v155_v32 = vpop.xlane.xlu1 %154 }
 0x216   :  { %v156_v33 = vsub.f32 %v151_v30, %v155_v32 }
 0x218   :  { %v157_v34 = vmul.f32 1.442695, %v156_v33 }
 0x21a   :  { %406 = vpow2.f32 %v157_v34 }
 0x224   :  { %v407_v35 = vpop.eup %406 }
 0x225   :  { %v159_v36 = vsel %vm152_vm4, %v407_v35, 0.0 }
 0x226   :  { %160 = vadd.xlane.f32.xlu1 %v159_v36 }
 0x2b3   :  { %v161_v38 = vpop.xlane.xlu1 %160 }
 0x2b4   :  { %408 = vrcp.f32 %v161_v38 }
 0x2be   :  { %v409_v43 = vpop.eup %408 }
 0x2bf   :  { %v163_v44 = vmul.f32 %v409_v43, %v407_v35 }
 0x2c1   :  { %v171_v45 = vrot.slane %v163_v44, %v170_v42 }
 0x2c3   :  { %v172_v46 = vcombine.high %v171_v45, %v171_v45  ;;  %v179_v47 = vrot.slane %v171_v45, %v170_v42 }
 0x2c5   :  { %383 = vmatmul.mubr.msk.f32.vlgmr.msra.gmra.mrb[0].mxu1 %vm187_vm6, %v179_v47  ;;  %v186_v48 = vrot.slane %v172_v46, %v170_v42 }
 0x2c6   :  { %386 = vmatpush3.msra.mxu1 %v22_v7  ;;  %387 = vmatprep.mubr.msk.f32.mxu1 %vm435_vm5, %v434_v37 }
 0x2c9   :  { %388 = vmatmul.mubr.msk.f32.vlgmr.msra.gmra.mrb[2].mxu1 %vm187_vm6, %v186_v48 }
 0x398   :  { %v256_v49 = vpop.f32.mrb[0].mxu1 }
 0x399   :  { %v384_v50 = vpop.f32.mrb[1].mxu1 }
 0x39c   :  { %v328_v51 = vpop.f32.mrb[2].mxu1 }
 0x39d   :  { %v334_v52 = vrot.slane %v328_v51, 7  ;;  %v389_v53 = vpop.f32.mrb[3].mxu1 }
 0x39f   :  { %v335_v54 = vsel %vm148_vm2, %v334_v52, %v256_v49 }
 0x3a0   :  { %338 = vst.msk [vmem:[#allocation2] sm:$0x3] %vm337_vm7, %v335_v54 }
 0x3a1   :  { %421 = shalt.err (!%p418_p4)
}
 0x3a2   :  { %s422_s11 = scalar_lea.hbm %s516_s5, 32 }
 0x3a3   :  { %p423_p5 = scmp.ne.s32.totalorder %s516_s5, %s422_s11  ;;  %p426_p6 = scmp.lt.u32.totalorder %s422_s11, %s516_s5 }
 0x3a5   :  { %p428_p7 = pnand %p426_p6, %p423_p5 }
 0x3a7   :  { %431 = shalt.err (!%p428_p7)
}
 0x3a8   :  { %348 = dma.vmem_to_hbm [thread:$0]  %s346_s4, 32, %s516_s5, [#allocation3]  }
 0x3a9   :  { %432 = dma.done.wait [#allocation3], 32  }
 0x3aa   :  { %433 = vsyncadd [#allocation3], 4294967264 }
 0x3ab   :  { %352 = vsyncpa [#allocation3], 1 }

</bundles_post_ra>
